<compile_context>
chip_gen: v7x
topology: tpu7x:2x2x1
jax: 0.10.0
libtpu: 0.0.40
codegen_flags: <defaults>
</compile_context>

<pallas_src>
from functools import lru_cache

import numpy as np

import jax
import jax.numpy as jnp
from jax.experimental import pallas as pl
from jax.experimental.pallas import tpu as pltpu


def _time_pos_emb_kernel(t_ref, wo_ref, o_ref):
    # t_ref:  (rows, L) float32, lane-expanded time indices (L = fold * E)
    # wo_ref: (2, L)    float32, row 0 = per-lane frequency, row 1 = phase offset
    # o_ref:  (rows, L) output
    wo = wo_ref[...]
    w = wo[0:1, :]                                  # (1, L)
    off = wo[1:2, :]                                # (1, L): 0 on even cols, pi/2 on odd
    phase = t_ref[...] * w + off                    # (rows, L)
    # sin(phase) on even columns; sin(phase + pi/2) == cos(phase) on odd columns.
    o_ref[...] = jnp.sin(phase).astype(o_ref.dtype)


@lru_cache(maxsize=None)
def _column_constants(embedding_size: int, fold: int):
    """Cached (2, fold*E) f32 constant: [frequencies; phase offsets], lane-tiled."""
    E = embedding_size
    j = np.arange(E)
    k2 = (2 * (j // 2)).astype(np.float32)          # even/odd pairs share frequency 2k
    w = np.exp(-np.log(10000.0) * k2 / np.float32(E)).astype(np.float32)
    off = ((j % 2).astype(np.float32) * np.float32(np.pi / 2.0))
    wo = np.stack([np.tile(w, fold), np.tile(off, fold)], axis=0)   # (2, fold*E)
    return jnp.asarray(wo)


def _time_pos_emb_jnp(batch_t: jax.Array, embedding_size: int) -> jax.Array:
    """No-kernel path for tiny problems (launch overhead >> math)."""
    wo = _column_constants(embedding_size, 1)
    t = batch_t.astype(jnp.float32)[:, None]
    return jnp.sin(t * wo[0:1, :] + wo[1:2, :])


def time_position_embedding(batch_t: jax.Array, embedding_size: int, *,
                            block_rows: int = 1024,
                            out_dtype=jnp.float32,
                            use_pallas: bool | None = None) -> jax.Array:
    """batch_t: (B,) integer time indices. Returns (B, embedding_size) array.

    block_rows: folded-row tile height for the Pallas grid (multiple of 8).
    use_pallas: None = auto (jnp for tiny problems, Pallas otherwise);
                True/False forces the choice.
    """
    B = batch_t.shape[0]
    E = embedding_size
    assert E % 2 == 0, "embedding_size must be even"
    assert block_rows % 8 == 0, "block_rows must be a multiple of 8"

    if use_pallas is None:
        use_pallas = (B * E) > 8192
    if not use_pallas:
        return _time_pos_emb_jnp(batch_t, E).astype(out_dtype)

    # Fold several batch rows into the 128-lane dimension when E divides 128.
    fold = (128 // E) if (E <= 128 and 128 % E == 0) else 1
    lane_width = fold * E
    wo = _column_constants(E, fold)                  # (2, lane_width)

    # Grid sizing over folded rows.
    rows = -(-B // fold)                             # cdiv
    if rows <= block_rows:
        block_rows_eff, num_blocks = rows, 1         # single tile == full array dims
    else:
        block_rows_eff, num_blocks = block_rows, -(-rows // block_rows)
    rows_pad = block_rows_eff * num_blocks
    b_pad = rows_pad * fold

    # Lane-dense t slab: t_folded[r, g*E + j] = t[r*fold + g]  (layout plumbing only).
    t = batch_t.astype(jnp.float32)
    if b_pad != B:
        t = jnp.pad(t, (0, b_pad - B))
    t_folded = jnp.repeat(t.reshape(rows_pad, fold), E, axis=1)     # (rows_pad, lane_width)

    out_folded = pl.pallas_call(
        _time_pos_emb_kernel,
        out_shape=jax.ShapeDtypeStruct((rows_pad, lane_width), out_dtype),
        grid_spec=pltpu.PrefetchScalarGridSpec(
            num_scalar_prefetch=0,
            grid=(num_blocks,),
            in_specs=[
                pl.BlockSpec((block_rows_eff, lane_width), lambda i: (i, 0)),
                pl.BlockSpec((2, lane_width), lambda i: (0, 0)),
            ],
            out_specs=pl.BlockSpec((block_rows_eff, lane_width), lambda i: (i, 0)),
        ),
        compiler_params=pltpu.CompilerParams(
            dimension_semantics=("parallel",)),      # shards folded rows across v7x's 2 TCs
    )(t_folded, wo)

    # Unfold lanes back to (B, E).
    return out_folded.reshape(rows_pad * fold, E)[:B]


def _reference(batch_t, embedding_size, seq_len):
    # Pure-JAX reference reproducing the PyTorch buffer + gather.
    seq_index = jnp.arange(seq_len, dtype=jnp.float32)[:, None]
    freqs = jnp.exp(
        -jnp.log(10000.0) * jnp.arange(0, embedding_size, 2, dtype=jnp.float32)
        / embedding_size
    )
    fill = seq_index * freqs
    table = jnp.zeros((seq_len, embedding_size), jnp.float32)
    table = table.at[:, 0::2].set(jnp.sin(fill))
    table = table.at[:, 1::2].set(jnp.cos(fill))
    return table[batch_t]


if __name__ == "__main__":
    T = 1000            # buffer length of the PyTorch module
    EMB = 32            # embedding_size
    B = 8               # batch of time indices

    key = jax.random.PRNGKey(0)
    batch_t = jax.random.randint(key, (B,), minval=0, maxval=T, dtype=jnp.int32)
    ref_small = _reference(batch_t, EMB, T)

    # Shipped small size: exercise the Pallas kernel (single full-array tile) ...
    out_small = jax.block_until_ready(
        time_position_embedding(batch_t, EMB, use_pallas=True))
    assert out_small.shape == (B, EMB) and out_small.dtype == jnp.float32
    assert jnp.allclose(out_small, ref_small, atol=1e-4, rtol=1e-4)

    # ... and the default no-kernel fast path the review recommends for this size.
    out_fast = jax.block_until_ready(time_position_embedding(batch_t, EMB))
    assert jnp.allclose(out_fast, ref_small, atol=1e-4, rtol=1e-4)

    # Larger batch: lane-dense tiled path (fold=4 rows per vreg-row, 2 parallel grid steps).
    B2 = 8192
    batch_t2 = jax.random.randint(jax.random.PRNGKey(1), (B2,), 0, T, dtype=jnp.int32)
    out2 = jax.block_until_ready(time_position_embedding(batch_t2, EMB))
    ref2 = _reference(batch_t2, EMB, T)
    assert out2.shape == (B2, EMB)
    assert jnp.allclose(out2, ref2, atol=1e-4, rtol=1e-4)

    print("KERNEL_OK")
</pallas_src>

<mosaic_0001>
module attributes {stable_mosaic.version = 11 : i64} {
  func.func @_time_pos_emb_kernel(%arg0: i32, %arg1: memref<2x128xf32, #tpu.memory_space<vmem>>, %arg2: memref<2x128xf32, #tpu.memory_space<vmem>>, %arg3: memref<2x128xf32, #tpu.memory_space<vmem>>) attributes {dimension_semantics = [#tpu.dimension_semantics<parallel>], iteration_bounds = array<i64: 1>, scalar_prefetch = 0 : i64, scratch_operands = 0 : i64, tpu.core_type = #tpu.core_type<tc>, window_params = [{transform_indices = @transform_0, window_bounds = array<i64: 2, 128>}, {pipeline_mode = #tpu.pipeline_mode<synchronous>, transform_indices = @transform_1, window_bounds = array<i64: 2, 128>}, {transform_indices = @transform_2, window_bounds = array<i64: 2, 128>}]} {
    %c0 = arith.constant 0 : index
    %c0_0 = arith.constant 0 : index
    %0 = vector.load %arg2[%c0, %c0_0] : memref<2x128xf32, #tpu.memory_space<vmem>>, vector<2x128xf32>
    %1 = vector.extract_strided_slice %0 {offsets = [0, 0], sizes = [1, 128], strides = [1, 1]} : vector<2x128xf32> to vector<1x128xf32>
    %2 = vector.extract_strided_slice %0 {offsets = [1, 0], sizes = [1, 128], strides = [1, 1]} : vector<2x128xf32> to vector<1x128xf32>
    %c0_1 = arith.constant 0 : index
    %c0_2 = arith.constant 0 : index
    %3 = vector.load %arg1[%c0_1, %c0_2] : memref<2x128xf32, #tpu.memory_space<vmem>>, vector<2x128xf32>
    %4 = vector.broadcast %1 : vector<1x128xf32> to vector<2x128xf32>
    %5 = arith.mulf %3, %4 : vector<2x128xf32>
    %6 = vector.broadcast %2 : vector<1x128xf32> to vector<2x128xf32>
    %7 = arith.addf %5, %6 : vector<2x128xf32>
    %8 = math.sin %7 : vector<2x128xf32>
    %c0_3 = arith.constant 0 : index
    %c0_4 = arith.constant 0 : index
    %9 = vector.load %arg3[%c0_3, %c0_4] : memref<2x128xf32, #tpu.memory_space<vmem>>, vector<2x128xf32>
    tpu.vector_store %arg3[%c0_3, %c0_4], %8 {strides = array<i32>} : memref<2x128xf32, #tpu.memory_space<vmem>>, vector<2x128xf32>,
    return
  }
  func.func @transform_0(%arg0: i32) -> (i32, i32) {
    %c0_i32 = arith.constant 0 : i32
    %c0_i32_0 = arith.constant 0 : i32
    return %arg0, %c0_i32 : i32, i32
  }
  func.func @transform_1(%arg0: i32) -> (i32, i32) {
    %c0_i32 = arith.constant 0 : i32
    %c0_i32_0 = arith.constant 0 : i32
    %c0_i32_1 = arith.constant 0 : i32
    return %c0_i32, %c0_i32_0 : i32, i32
  }
  func.func @transform_2(%arg0: i32) -> (i32, i32) {
    %c0_i32 = arith.constant 0 : i32
    %c0_i32_0 = arith.constant 0 : i32
    return %arg0, %c0_i32 : i32, i32
  }
}

</mosaic_0001>

<bundles_post_ra>
// kernel: tpu_custom_call.1
= control target key start
LH: loop header
LB: loop body
LE: loop exit
PB: predicated region body
PF: predicated region fallthrough
CT: control target
= control target key end

     0   :  { %7 = vsyncpa [#allocation3], 0  ;;  %s295_s0 = inlined_call_operand.hbm [shape: f32[2,128], index: 0, kind: input, shape index: {}]   ;;  %s296_s1 = inlined_call_operand.vmem [shape: f32[2,128], index: 1, kind: input, shape index: {}]   ;;  %s297_s2 = inlined_call_operand.hbm [shape: f32[2,128], index: 2, kind: output, shape index: {}]  }
   0x1   :  { %8 = vsyncpa [#allocation4], 0  ;;  %s224_s9 = smov [#allocation2]   ;;  %s176_s13 = scalar_lea.hbm %s295_s0, 32 }
   0x2   :  { %s15_s10 = sshll.u32 %s224_s9, 4  ;;  %p177_p0 = scmp.ne.s32.totalorder %s295_s0, %s176_s13  ;;  %s16_s10 = int_to_ptr.vmem [resolvable:$true] %s15_s10 }
   0x3   :  { %p180_p1 = scmp.lt.u32.totalorder %s176_s13, %s295_s0 }
   0x5   :  { %p182_p2 = pnand %p180_p1, %p177_p0 }
   0x7   :  { %185 = shalt.err (!%p182_p2)
}
   0x8   :  { %s186_s18 = scalar_lea.vmem %s16_s10, 32  ;;  %p191_p4 = scmp.lt.s32.totalorder %s16_s10, %s16_s10 }
   0x9   :  { %p187_p3 = scmp.ne.s32.totalorder %s16_s10, %s186_s18  ;;  %p192_p5 = scmp.lt.s32.totalorder %s186_s18, %s186_s18 }
   0xb   :  { %p193_p6 = por %p192_p5, %p191_p4 }
   0xd   :  { %p194_p7 = pnand %p193_p6, %p187_p3 }
   0xf   :  { %197 = shalt.err (!%p194_p7)
}
  0x10   :  { %18 = dma.hbm_to_vmem [thread:$0]  %s295_s0, 32, %s16_s10, [#allocation3]  }
  0x11   :  { %220 = dma.done.wait [#allocation3], 32  }
  0x12   :  { %221 = vsyncadd [#allocation3], 4294967264  ;;  %v26_v0 = vlaneseq  ;;  %v24_v4 = vld [vmem:[%s296_s1] sm:$0x3]  ;;  %v225_v21 = vmov 683565275  }
  0x13   :  { %v25_v5 = vld [vmem:[#allocation2] sm:$0x3]  ;;  %v226_v23 = vmov 2475754826   ;;  %v227_v25 = vmov 2131351028  }
  0x14   :  { %v27_v1 = vshrl.u32 %v26_v0, 7  ;;  %v228_v27 = vmov 2102212464   ;;  %v229_v29 = vmov 920167782   ;;  %s231_s0 = smov [#allocation5]  }
  0x15   :  { %v230_v36 = vmov 1326507024   ;;  %s147_s1 = sshll.u32 %s231_s0, 4  ;;  %s148_s1 = int_to_ptr.vmem [resolvable:$true] %s147_s1 }
  0x16   :  { %v28_v2 = vsub.s32 0, %v27_v1  ;;  %v33_v3 = vsub.s32 1, %v27_v1  ;;  %s198_s23 = scalar_lea.vmem %s148_s1, 32  ;;  %p203_p9 = scmp.lt.s32.totalorder %s148_s1, %s148_s1 }
  0x17   :  { %p199_p8 = scmp.ne.s32.totalorder %s148_s1, %s198_s23  ;;  %p204_p10 = scmp.lt.s32.totalorder %s198_s23, %s198_s23 }
  0x18   :  { %v29_v6 = vrot.slane %v24_v4, %v28_v2  ;;  %v34_v7 = vrot.slane %v24_v4, %v33_v3 }
  0x19   :  { %p205_p11 = por %p204_p10, %p203_p9 }
  0x1a   :  { %v30_v8 = vmul.f32 %v29_v6, %v25_v5 }
  0x1b   :  { %p206_p12 = pnand %p205_p11, %p199_p8 }
  0x1c   :  { %v262_v9 = vadd.f32 %v34_v7, %v30_v8 }
  0x1e   :  { %v39_v10 = vand.u32 2139095040, %v262_v9  ;;  %v36_v12 = vand.u32 2147483647, %v262_v9  ;;  %vm38_vm7 = vcmp.lt.s32.totalorder %v262_v9, 0  ;;  %vm128_vm12 = vweird.f32 %v262_v9 }
  0x20   :  { %v40_v11 = vshrl.u32 %v39_v10, 23  ;;  %v43_v15 = vand.u32 8388607, %v36_v12  ;;  %vm37_vm8 = vcmp.le.f32.partialorder %v36_v12, 0.7853982 }
  0x22   :  { %v156_v13 = vadd.s32 4294967169, %v40_v11  ;;  %v44_v18 = vor.u32 8388608, %v43_v15 }
  0x24   :  { %v46_v14 = vadd.s32 1, %v156_v13  ;;  %v84_v38 = vshll.u32 %v44_v18, 8 }
  0x26   :  { %vm47_vm0 = vcmp.gt.s32.totalorder %v46_v14, 0 }
  0x27   :  { %v48_v16 = vsel %vm47_vm0, %v46_v14, 0 }
  0x28   :  { %v50_v17 = vand.u32 31, %v48_v16  ;;  %v49_v19 = vshrl.u32 %v48_v16, 5 }
  0x2a   :  { %v51_v20 = vsub.s32 32, %v50_v17  ;;  %v53_v22 = vshll.u32 %v225_v21, %v50_v17  ;;  %v56_v24 = vshll.u32 %v226_v23, %v50_v17  ;;  %v59_v26 = vshll.u32 %v227_v25, %v50_v17 }
  0x2b   :  { %v62_v28 = vshll.u32 %v228_v27, %v50_v17  ;;  %v65_v30 = vshll.u32 %v229_v29, %v50_v17  ;;  %vm68_vm1 = vcmp.lt.s32.totalorder %v49_v19, 1  ;;  %vm71_vm2 = vcmp.lt.s32.totalorder %v49_v19, 4 }
  0x2c   :  { %v52_v31 = vshrl.u32 %v225_v21, %v51_v20  ;;  %v54_v32 = vshrl.u32 %v226_v23, %v51_v20  ;;  %v57_v33 = vshrl.u32 %v227_v25, %v51_v20  ;;  %v60_v34 = vshrl.u32 %v228_v27, %v51_v20 }
  0x2d   :  { %v63_v35 = vshrl.u32 %v229_v29, %v51_v20  ;;  %v66_v37 = vshrl.u32 %v230_v36, %v51_v20  ;;  %vm69_vm3 = vcmp.lt.s32.totalorder %v49_v19, 2  ;;  %vm70_vm4 = vcmp.lt.s32.totalorder %v49_v19, 3 }
  0x2e   :  { %v55_v39 = vor.u32 %v54_v32, %v53_v22  ;;  %v58_v40 = vor.u32 %v57_v33, %v56_v24  ;;  %v61_v41 = vor.u32 %v60_v34, %v59_v26 }
  0x2f   :  { %v64_v42 = vor.u32 %v63_v35, %v62_v28  ;;  %v67_v43 = vor.u32 %v66_v37, %v65_v30 }
  0x30   :  { %v72_v44 = vsel %vm68_vm1, %v52_v31, %v55_v39  ;;  %v73_v45 = vsel %vm71_vm2, %v61_v41, 2102212464  ;;  %v76_v46 = vsel %vm68_vm1, %v55_v39, %v58_v40  ;;  %v80_v47 = vsel %vm68_vm1, %v58_v40, %v61_v41 }
  0x31   :  { %v74_v48 = vsel %vm70_vm4, %v58_v40, %v73_v45  ;;  %v77_v49 = vsel %vm71_vm2, %v64_v42, 920167782  ;;  %v81_v50 = vsel %vm71_vm2, %v67_v43, 1326507024 }
  0x32   :  { %v78_v51 = vsel %vm70_vm4, %v61_v41, %v77_v49  ;;  %v82_v52 = vsel %vm70_vm4, %v64_v42, %v81_v50  ;;  %v75_v53 = vsel %vm69_vm3, %v72_v44, %v74_v48 }
  0x33   :  { %v79_v54 = vsel %vm69_vm3, %v76_v46, %v78_v51  ;;  %v83_v55 = vsel %vm69_vm3, %v80_v47, %v82_v52  ;;  %v91_v60 = vmul.u32 %v84_v38, %v75_v53 }
  0x34   :  { %v268_v56 = vmul.u32.u64.low %v84_v38, %v83_v55  ;;  %v269_v57 = vmul.u32.u64.high %v84_v38, %v83_v55, %v268_v56  ;;  %v271_v58 = vmul.u32.u64.low %v84_v38, %v79_v54  ;;  %v272_v59 = vmul.u32.u64.high %v84_v38, %v79_v54, %v271_v58 }
  0x36   :  { %vm93_vm5 = vc.u32 %v269_v57, %v271_v58  ;;  %v94_v61 = vadd.s32 1, %v272_v59  ;;  %v92_v8 = vadd.s32 %v271_v58, %v269_v57 }
  0x38   :  { %v95_v62 = vsel %vm93_vm5, %v94_v61, %v272_v59 }
  0x39   :  { %v96_v63 = vadd.s32 %v95_v62, %v91_v60 }
  0x3b   :  { %v97_v0 = vadd.s32 536870912, %v96_v63 }
  0x3d   :  { %v98_v1 = vshrl.u32 %v97_v0, 30 }
  0x3f   :  { %v99_v2 = vshll.u32 %v98_v1, 30  ;;  %v122_v22 = vsub.s32 4, %v98_v1 }
  0x41   :  { %v100_v3 = vsub.s32 %v96_v63, %v99_v2  ;;  %v123_v25 = vsel %vm38_vm7, %v122_v22, %v98_v1 }
  0x42   :  { %v125_v28 = vsel %vm37_vm8, 0, %v123_v25 }
  0x43   :  { %v102_v4 = vsub.s32 0, %v100_v3  ;;  %v129_v29 = vadd.s32 3, %v125_v28 }
  0x45   :  { %v157_v5 = vmin.u32 %v102_v4, %v100_v3  ;;  %v130_v30 = vand.u32 3, %v129_v29 }
  0x47   :  { %v104_v6 = vclz %v157_v5  ;;  %vm135_vm9 = vcmp.eq.s32.totalorder %v130_v30, 2  ;;  %vm132_vm10 = vcmp.eq.s32.totalorder %v130_v30, 0  ;;  %vm131_vm11 = vcmp.lt.s32.totalorder %v130_v30, 2 }
  0x49   :  { %v158_v7 = vadd.s32 4294967294, %v104_v6 }
  0x4b   :  { %vm159_vm6 = vcmp.lt.s32.totalorder %v158_v7, 0 }
  0x4c   :  { %v107_v10 = vsel %vm159_vm6, 0, %v158_v7 }
  0x4d   :  { %v108_v11 = vsub.s32 32, %v107_v10  ;;  %v109_v13 = vshll.u32 %v100_v3, %v107_v10  ;;  %v112_v14 = vsub.s32 4294967266, %v107_v10 }
  0x4f   :  { %v110_v15 = vshrl.u32 %v92_v8, %v108_v11  ;;  %v113_v16 = vadd.s32 127, %v112_v14 }
  0x51   :  { %v111_v17 = vor.u32 %v110_v15, %v109_v13  ;;  %v114_v18 = vshll.u32 %v113_v16, 23 }
  0x53   :  { %v115_v19 = vor.u32 4788187, %v114_v18  ;;  %v118_v20 = vcvt.s32.f32 %v111_v17 }
  0x55   :  { %v116_v21 = vand.u32 2147483647, %v115_v19 }
  0x57   :  { %v119_v23 = vmul.f32 %v118_v20, %v116_v21 }
  0x59   :  { %v120_v24 = vxor.u32 2147483648, %v119_v23 }
  0x5b   :  { %v121_v26 = vsel %vm38_vm7, %v120_v24, %v119_v23 }
  0x5c   :  { %v124_v27 = vsel %vm37_vm8, %v262_v9, %v121_v26 }
  0x5d   :  { %172 = vcosq.f32 %v124_v27 }
  0x5e   :  { %174 = vsinq.f32 %v124_v27 }
  0x67   :  { %v173_v31 = vpop.eup %172 }
  0x68   :  { %v175_v32 = vpop.eup %174  ;;  %v136_v33 = vxor.u32 2147483648, %v173_v31 }
  0x69   :  { %v133_v34 = vxor.u32 2147483648, %v175_v32 }
  0x6a   :  { %v137_v12 = vsel %vm135_vm9, %v136_v33, %v175_v32 }
  0x6b   :  { %v134_v35 = vsel %vm132_vm10, %v173_v31, %v133_v34 }
  0x6c   :  { %v138_v36 = vsel %vm131_vm11, %v134_v35, %v137_v12 }
  0x6d   :  { %v139_v37 = vsel %vm128_vm12, nan, %v138_v36 }
  0x6e   :  { %140 = vst [vmem:[#allocation5] sm:$0x3] %v139_v37 }
  0x6f   :  { %209 = shalt.err (!%p206_p12)
}
  0x70   :  { %s210_s26 = scalar_lea.hbm %s297_s2, 32 }
  0x71   :  { %p211_p13 = scmp.ne.s32.totalorder %s297_s2, %s210_s26  ;;  %p214_p0 = scmp.lt.u32.totalorder %s210_s26, %s297_s2 }
  0x73   :  { %p216_p1 = pnand %p214_p0, %p211_p13 }
  0x75   :  { %219 = shalt.err (!%p216_p1)
}
  0x76   :  { %150 = dma.vmem_to_hbm [thread:$0]  %s148_s1, 32, %s297_s2, [#allocation4]  }
  0x77   :  { %222 = dma.done.wait [#allocation4], 32  }
  0x78   :  { %223 = vsyncadd [#allocation4], 4294967264 }
  0x79   :  { %154 = vsyncpa [#allocation3], 1 }
  0x7a   :  { %155 = vsyncpa [#allocation4], 1 }

</bundles_post_ra>
